<compile_context>
chip_gen: v6e
topology: v6e:2x2x1
jax: 0.10.0
libtpu: 0.0.40
codegen_flags: <defaults>
</compile_context>

<pallas_src>
import functools

import jax
import jax.numpy as jnp
from jax.experimental import pallas as pl
from jax.experimental.pallas import tpu as pltpu

EPS = 1e-5


def _rup8(v):
    return (v + 7) // 8 * 8


def _pool_pieces(y, n, lp, lp_pad):
    """y: (n*2*lp_pad, c) post-ReLU conv output laid out [sample][even|odd] blocks.
    Returns per-sample pooled pieces (lp, c) = max(even, odd)."""
    pieces = []
    for nn in range(n):
        b = nn * 2 * lp_pad
        e = y[b:b + lp, :]
        o = y[b + lp_pad:b + lp_pad + lp, :]
        pieces.append(jnp.maximum(e, o))
    return pieces


def _bn_scale_shift(pieces, lp, gamma, beta):
    """Training-mode BatchNorm (batch stats, biased variance, two-pass) over the valid
    rows of all per-sample pieces.  Returns per-channel (scale, shift): y = x*scale+shift."""
    c = pieces[0].shape[1]
    cnt = float(len(pieces) * lp)
    s = jnp.zeros((1, c), jnp.float32)
    for p in pieces:
        s = s + jnp.sum(p, axis=0, keepdims=True)
    mean = s / cnt
    ss = jnp.zeros((1, c), jnp.float32)
    for p in pieces:
        d = p - mean
        ss = ss + jnp.sum(d * d, axis=0, keepdims=True)
    scale = jax.lax.rsqrt(ss / cnt + EPS) * gamma
    shift = beta - mean * scale
    return scale, shift


def _store_normalized(dst_ref, pieces, lp, lp_pad, scale, shift):
    """BN affine folded into the (aligned) per-sample stores; broadcasts hoisted."""
    c = pieces[0].shape[1]
    scale_b = jnp.broadcast_to(scale, (lp, c))
    shift_b = jnp.broadcast_to(shift, (lp, c))
    for nn, p in enumerate(pieces):
        dst_ref[pl.ds(nn * lp_pad, lp), :] = p * scale_b + shift_b


def _im2col_parity(src_ref, n, blk, lp_pad, c_in):
    """Parity-split im2col read from a blocked activation slab ref.

    Per sample (block of `blk` rows, 8-aligned) read 4 stride-2 taps t0..t3 of length
    lp_pad (taps are shared between parities: even = [t0|t1|t2], odd = [t1|t2|t3]).
    Rows past the valid length only feed padded matmul rows that are never read back
    (the scratch slab is over-sized in the wrapper so all reads stay in-bounds).
    Returns (n*2*lp_pad, 3*c_in).
    """
    pieces = []
    for nn in range(n):
        base = nn * blk
        t = [src_ref[pl.ds(base + j, lp_pad, stride=2), :] for j in range(4)]
        pieces.append(jnp.concatenate(t[0:3], axis=1))   # even-parity windows
        pieces.append(jnp.concatenate(t[1:4], axis=1))   # odd-parity windows
    return jnp.concatenate(pieces, axis=0)


def cnn_kernel(cfg, x_ref, w_ref, p_ref, out_ref, st1_ref, st2_ref):
    n = cfg["n"]
    c1, c2, c3 = cfg["filters"]
    lp1, lp2, lp3 = cfg["lp"]
    lp1p, lp2p, lp3p = cfg["lpp"]
    o1, o2, o3 = cfg["w_off"]

    # ---- unpack the packed parameter slabs (2 VMEM loads instead of 14 separate DMAs)
    pv = p_ref[...]
    b1, g1, bt1 = pv[0:1, :c1], pv[1:2, :c1], pv[2:3, :c1]
    b2, g2, bt2 = pv[3:4, :c2], pv[4:5, :c2], pv[5:6, :c2]
    b3, g3, bt3 = pv[6:7, :c3], pv[7:8, :c3], pv[8:9, :c3]
    wl = pv[9:9 + lp3, :c3]                      # (lp3, c3): rows = length, cols = channel
    bl = pv[9 + lp3:10 + lp3, 0:1]               # (1, 1)

    w1 = w_ref[pl.ds(o1, 3), :][:, :c1]          # (3,    c1)
    w2 = w_ref[pl.ds(o2, 3 * c1), :][:, :c2]     # (3*c1, c2)
    w3 = w_ref[pl.ds(o3, 3 * c2), :][:, :c3]     # (3*c2, c3)

    # ---- stage 1: im2col was built in the wrapper; one MXU matmul for all samples/parities
    y1 = jnp.maximum(
        jnp.dot(x_ref[...], w1, preferred_element_type=jnp.float32) + b1, 0.0)
    p1 = _pool_pieces(y1, n, lp1, lp1p)
    sc1, sh1 = _bn_scale_shift(p1, lp1, g1, bt1)
    _store_normalized(st1_ref, p1, lp1, lp1p, sc1, sh1)

    # ---- stage 2: one matmul over the stacked parity-split im2col
    cols2 = _im2col_parity(st1_ref, n, lp1p, lp2p, c1)
    y2 = jnp.maximum(
        jnp.dot(cols2, w2, preferred_element_type=jnp.float32) + b2, 0.0)
    p2 = _pool_pieces(y2, n, lp2, lp2p)
    sc2, sh2 = _bn_scale_shift(p2, lp2, g2, bt2)
    _store_normalized(st2_ref, p2, lp2, lp2p, sc2, sh2)

    # ---- stage 3: kept as values; BN-3 affine folded into the linear head
    cols3 = _im2col_parity(st2_ref, n, lp2p, lp3p, c2)
    y3 = jnp.maximum(
        jnp.dot(cols3, w3, preferred_element_type=jnp.float32) + b3, 0.0)
    p3 = _pool_pieces(y3, n, lp3, lp3p)
    sc3, sh3 = _bn_scale_shift(p3, lp3, g3, bt3)

    # ---- linear + sigmoid:
    #   logit = sum((p*sc3+sh3) * wl) + bl = sum(p * (wl*sc3)) + (sum(wl*sh3) + bl)
    wl_eff = wl * sc3
    b_eff = jnp.sum(jnp.sum(wl * sh3, axis=1, keepdims=True),
                    axis=0, keepdims=True) + bl                       # (1, 1)
    logits = jnp.concatenate(
        [jnp.sum(jnp.sum(p * wl_eff, axis=1, keepdims=True), axis=0, keepdims=True)
         for p in p3], axis=0) + b_eff                                # (n, 1)
    out_ref[...] = pl.reciprocal(1.0 + jnp.exp(-logits), approx=True)


def cnn_forward(x_ncl, params, linear_size=4, filters=(30, 20, 10)):
    (w1, b1, g1, bt1, w2, b2, g2, bt2, w3, b3, g3, bt3, wl, bl) = params
    n, c0, l_in = x_ncl.shape
    assert c0 == 1
    c1, c2, c3 = filters
    f32 = jnp.float32

    lc1 = l_in - 2; lp1 = lc1 // 2
    lc2 = lp1 - 2;  lp2 = lc2 // 2
    lc3 = lp2 - 2;  lp3 = lc3 // 2
    assert lp3 == linear_size, "input length inconsistent with linear_size"
    lp1p, lp2p, lp3p = _rup8(lp1), _rup8(lp2), _rup8(lp3)

    # ---- stage-1 im2col + even/odd parity split + 8-row padding (layout plumbing only)
    xl = x_ncl[:, 0, :].astype(f32)                                  # (n, l_in)
    win = jnp.stack([xl[:, k:k + lc1] for k in range(3)], axis=-1)   # (n, lc1, 3)
    even = win[:, 0::2, :][:, :lp1, :]
    odd = win[:, 1::2, :][:, :lp1, :]
    pad = ((0, 0), (0, lp1p - lp1), (0, 0))
    x_cols = jnp.stack([jnp.pad(even, pad), jnp.pad(odd, pad)], axis=1)
    x_cols = x_cols.reshape(n * 2 * lp1p, 3)                         # (n*2*lp1p, k)

    # ---- pack the three conv weights into one slab (one DMA), 8-aligned row offsets
    def conv_w(w):   # (Co, Ci, K) -> (K*Ci, Co); row index = k*Ci + ci (matches im2col)
        co, ci, k = w.shape
        return jnp.transpose(w, (2, 1, 0)).reshape(k * ci, co).astype(f32)

    wks = [conv_w(w1), conv_w(w2), conv_w(w3)]
    cmax = max(c1, c2, c3)
    offs, cur = [], 0
    for wk in wks:
        offs.append(cur)
        cur = _rup8(cur + wk.shape[0])
    w_all = jnp.zeros((cur, cmax), f32)
    for off, wk in zip(offs, wks):
        w_all = w_all.at[off:off + wk.shape[0], :wk.shape[1]].set(wk)

    # ---- pack bias/gamma/beta (x3 stages) + linear weight/bias into one slab (one DMA)
    p_rows = _rup8(9 + lp3 + 1)
    p_all = jnp.zeros((p_rows, cmax), f32)
    for r, v in enumerate((b1, g1, bt1, b2, g2, bt2, b3, g3, bt3)):
        p_all = p_all.at[r, :v.shape[0]].set(v.astype(f32))
    # torch flatten order is (channel, length); kernel piece order is (length, channel)
    wlk = wl.reshape(c3, lp3).T.astype(f32)                          # (lp3, c3)
    p_all = p_all.at[9:9 + lp3, :c3].set(wlk)
    p_all = p_all.at[9 + lp3, 0].set(bl.reshape(()).astype(f32))

    # scratch slabs: per-sample blocks at 8-aligned offsets, plus a tail so the padded
    # stride-2 im2col taps of the next stage always stay in-bounds (pad rows never feed
    # valid outputs).
    st1_rows = max(n * lp1p, _rup8((n - 1) * lp1p + 3 + 2 * (lp2p - 1) + 1))
    st2_rows = max(n * lp2p, _rup8((n - 1) * lp2p + 3 + 2 * (lp3p - 1) + 1))

    cfg = dict(n=n, filters=(c1, c2, c3), lp=(lp1, lp2, lp3),
               lpp=(lp1p, lp2p, lp3p), w_off=tuple(offs))

    vmem = pl.BlockSpec(memory_space=pltpu.MemorySpace.VMEM)
    return pl.pallas_call(
        functools.partial(cnn_kernel, cfg),
        out_shape=jax.ShapeDtypeStruct((n, 1), f32),
        in_specs=[vmem, vmem, vmem],
        out_specs=vmem,
        scratch_shapes=[
            pltpu.VMEM((st1_rows, c1), f32),   # stage-1 normalized activations
            pltpu.VMEM((st2_rows, c2), f32),   # stage-2 normalized activations
        ],
    )(x_cols, w_all, p_all)


def ref_forward(x, params, linear_size=4, filters=(30, 20, 10)):
    """Pure-JAX reference mirroring the torch forward (NCL layout)."""
    (w1, b1, g1, bt1, w2, b2, g2, bt2, w3, b3, g3, bt3, wl, bl) = params

    def conv1d(h, w, b):
        y = jax.lax.conv_general_dilated(
            h, w, window_strides=(1,), padding="VALID",
            dimension_numbers=("NCH", "OIH", "NCH"),
            precision=jax.lax.Precision.HIGHEST)
        return y + b[None, :, None]

    def maxpool2(h):
        nb, c, l = h.shape
        return jnp.max(h[:, :, : (l // 2) * 2].reshape(nb, c, l // 2, 2), axis=-1)

    def bn(h, g, bt):
        m = jnp.mean(h, axis=(0, 2), keepdims=True)
        v = jnp.mean((h - m) ** 2, axis=(0, 2), keepdims=True)
        return (h - m) * jax.lax.rsqrt(v + EPS) * g[None, :, None] + bt[None, :, None]

    h = bn(maxpool2(jax.nn.relu(conv1d(x, w1, b1))), g1, bt1)
    h = bn(maxpool2(jax.nn.relu(conv1d(h, w2, b2))), g2, bt2)
    h = bn(maxpool2(jax.nn.relu(conv1d(h, w3, b3))), g3, bt3)
    flat = h.reshape(h.shape[0], -1)
    return jax.nn.sigmoid(flat @ wl.T + bl[None, :])


if __name__ == "__main__":
    linear_size, filters = 4, (30, 20, 10)
    batch, l_in = 2, 46   # 46 -(conv/pool)-> 22 -> 10 -> 4 == linear_size

    keys = jax.random.split(jax.random.PRNGKey(0), 9)
    w1 = jax.random.normal(keys[0], (filters[0], 1, 3), jnp.float32) * 0.4
    b1 = jax.random.normal(keys[1], (filters[0],), jnp.float32) * 0.1
    w2 = jax.random.normal(keys[2], (filters[1], filters[0], 3), jnp.float32) * 0.15
    b2 = jax.random.normal(keys[3], (filters[1],), jnp.float32) * 0.1
    w3 = jax.random.normal(keys[4], (filters[2], filters[1], 3), jnp.float32) * 0.15
    b3 = jax.random.normal(keys[5], (filters[2],), jnp.float32) * 0.1
    wl = jax.random.normal(keys[6], (1, filters[2] * linear_size), jnp.float32) * 0.2
    bl = jax.random.normal(keys[7], (1,), jnp.float32) * 0.1
    g1, bt1 = jnp.ones((filters[0],), jnp.float32), jnp.zeros((filters[0],), jnp.float32)
    g2, bt2 = jnp.ones((filters[1],), jnp.float32), jnp.zeros((filters[1],), jnp.float32)
    g3, bt3 = jnp.ones((filters[2],), jnp.float32), jnp.zeros((filters[2],), jnp.float32)
    params = (w1, b1, g1, bt1, w2, b2, g2, bt2, w3, b3, g3, bt3, wl, bl)

    x = jax.random.normal(keys[8], (batch, 1, l_in), jnp.float32)

    out = jax.block_until_ready(cnn_forward(x, params, linear_size, filters))
    ref = ref_forward(x, params, linear_size, filters)

    assert out.shape == (batch, 1)
    assert bool(jnp.all(jnp.isfinite(out)))
    assert bool(jnp.max(jnp.abs(out - ref)) < 1e-2)
    print("KERNEL_OK")
</pallas_src>

<mosaic_0001>
module attributes {stable_mosaic.version = 11 : i64} {
  func.func @cnn_kernel(%arg0: memref<96x3xf32, #tpu.memory_space<vmem>>, %arg1: memref<168x30xf32, #tpu.memory_space<vmem>>, %arg2: memref<16x30xf32, #tpu.memory_space<vmem>>, %arg3: memref<2x1xf32, #tpu.memory_space<vmem>>, %arg4: memref<64x30xf32, #tpu.memory_space<vmem>>, %arg5: memref<40x20xf32, #tpu.memory_space<vmem>>) attributes {dimension_semantics = [], scalar_prefetch = 0 : i64, scratch_operands = 2 : i64, tpu.core_type = #tpu.core_type<tc>} {
    %c0 = arith.constant 0 : index
    %c0_0 = arith.constant 0 : index
    %0 = vector.load %arg2[%c0, %c0_0] : memref<16x30xf32, #tpu.memory_space<vmem>>, vector<16x30xf32>
    %1 = vector.extract_strided_slice %0 {offsets = [0, 0], sizes = [1, 30], strides = [1, 1]} : vector<16x30xf32> to vector<1x30xf32>
    %2 = vector.extract_strided_slice %0 {offsets = [1, 0], sizes = [1, 30], strides = [1, 1]} : vector<16x30xf32> to vector<1x30xf32>
    %3 = vector.extract_strided_slice %0 {offsets = [2, 0], sizes = [1, 30], strides = [1, 1]} : vector<16x30xf32> to vector<1x30xf32>
    %4 = vector.extract_strided_slice %0 {offsets = [3, 0], sizes = [1, 20], strides = [1, 1]} : vector<16x30xf32> to vector<1x20xf32>
    %5 = vector.extract_strided_slice %0 {offsets = [4, 0], sizes = [1, 20], strides = [1, 1]} : vector<16x30xf32> to vector<1x20xf32>
    %6 = vector.extract_strided_slice %0 {offsets = [5, 0], sizes = [1, 20], strides = [1, 1]} : vector<16x30xf32> to vector<1x20xf32>
    %7 = vector.extract_strided_slice %0 {offsets = [6, 0], sizes = [1, 10], strides = [1, 1]} : vector<16x30xf32> to vector<1x10xf32>
    %8 = vector.extract_strided_slice %0 {offsets = [7, 0], sizes = [1, 10], strides = [1, 1]} : vector<16x30xf32> to vector<1x10xf32>
    %9 = vector.extract_strided_slice %0 {offsets = [8, 0], sizes = [1, 10], strides = [1, 1]} : vector<16x30xf32> to vector<1x10xf32>
    %10 = vector.extract_strided_slice %0 {offsets = [9, 0], sizes = [4, 10], strides = [1, 1]} : vector<16x30xf32> to vector<4x10xf32>
    %11 = vector.extract_strided_slice %0 {offsets = [13, 0], sizes = [1, 1], strides = [1, 1]} : vector<16x30xf32> to vector<1x1xf32>
    %c0_1 = arith.constant 0 : index
    %c0_2 = arith.constant 0 : index
    %12 = vector.load %arg1[%c0_1, %c0_2] : memref<168x30xf32, #tpu.memory_space<vmem>>, vector<3x30xf32>
    %c8 = arith.constant 8 : index
    %c0_3 = arith.constant 0 : index
    %13 = vector.load %arg1[%c8, %c0_3] : memref<168x30xf32, #tpu.memory_space<vmem>>, vector<90x30xf32>
    %14 = vector.extract_strided_slice %13 {offsets = [0, 0], sizes = [90, 20], strides = [1, 1]} : vector<90x30xf32> to vector<90x20xf32>
    %c104 = arith.constant 104 : index
    %c0_4 = arith.constant 0 : index
    %15 = vector.load %arg1[%c104, %c0_4] : memref<168x30xf32, #tpu.memory_space<vmem>>, vector<60x30xf32>
    %16 = vector.extract_strided_slice %15 {offsets = [0, 0], sizes = [60, 10], strides = [1, 1]} : vector<60x30xf32> to vector<60x10xf32>
    %c0_5 = arith.constant 0 : index
    %c0_6 = arith.constant 0 : index
    %17 = vector.load %arg0[%c0_5, %c0_6] : memref<96x3xf32, #tpu.memory_space<vmem>>, vector<96x3xf32>
    %cst = arith.constant dense<0.000000e+00> : vector<96x30xf32>
    %18 = tpu.matmul %17, %12, %cst {dimension_numbers = #tpu.dot_dimension_numbers<[1], [0], [0], [1], [0, 0, 1, 1], [], []>} : vector<96x3xf32>, vector<3x30xf32>, vector<96x30xf32> -> vector<96x30xf32>
    %19 = vector.broadcast %1 : vector<1x30xf32> to vector<96x30xf32>
    %20 = arith.addf %18, %19 : vector<96x30xf32>
    %cst_7 = arith.constant 0.000000e+00 : f32
    %21 = vector.broadcast %cst_7 : f32 to vector<96x30xf32>
    %22 = arith.maximumf %20, %21 : vector<96x30xf32>
    %23 = vector.extract_strided_slice %22 {offsets = [0, 0], sizes = [22, 30], strides = [1, 1]} : vector<96x30xf32> to vector<22x30xf32>
    %24 = vector.extract_strided_slice %22 {offsets = [24, 0], sizes = [22, 30], strides = [1, 1]} : vector<96x30xf32> to vector<22x30xf32>
    %25 = arith.maximumf %23, %24 : vector<22x30xf32>
    %26 = vector.extract_strided_slice %22 {offsets = [48, 0], sizes = [22, 30], strides = [1, 1]} : vector<96x30xf32> to vector<22x30xf32>
    %27 = vector.extract_strided_slice %22 {offsets = [72, 0], sizes = [22, 30], strides = [1, 1]} : vector<96x30xf32> to vector<22x30xf32>
    %28 = arith.maximumf %26, %27 : vector<22x30xf32>
    %cst_8 = arith.constant 0.000000e+00 : f32
    %29 = vector.broadcast %cst_8 : f32 to vector<1x30xf32>
    %cst_9 = arith.constant dense<0.000000e+00> : vector<30xf32>
    %30 = vector.multi_reduction <add>, %25, %cst_9 [0] : vector<22x30xf32> to vector<30xf32>
    %31 = vector.shape_cast %30 : vector<30xf32> to vector<1x30xf32>
    %32 = arith.addf %29, %31 : vector<1x30xf32>
    %cst_10 = arith.constant dense<0.000000e+00> : vector<30xf32>
    %33 = vector.multi_reduction <add>, %28, %cst_10 [0] : vector<22x30xf32> to vector<30xf32>
    %34 = vector.shape_cast %33 : vector<30xf32> to vector<1x30xf32>
    %35 = arith.addf %32, %34 : vector<1x30xf32>
    %cst_11 = arith.constant 4.400000e+01 : f32
    %36 = vector.broadcast %cst_11 : f32 to vector<1x30xf32>
    %37 = arith.divf %35, %36 : vector<1x30xf32>
    %cst_12 = arith.constant 0.000000e+00 : f32
    %38 = vector.broadcast %cst_12 : f32 to vector<1x30xf32>
    %39 = vector.broadcast %37 : vector<1x30xf32> to vector<22x30xf32>
    %40 = arith.subf %25, %39 : vector<22x30xf32>
    %41 = arith.mulf %40, %40 : vector<22x30xf32>
    %cst_13 = arith.constant dense<0.000000e+00> : vector<30xf32>
    %42 = vector.multi_reduction <add>, %41, %cst_13 [0] : vector<22x30xf32> to vector<30xf32>
    %43 = vector.shape_cast %42 : vector<30xf32> to vector<1x30xf32>
    %44 = arith.addf %38, %43 : vector<1x30xf32>
    %45 = vector.broadcast %37 : vector<1x30xf32> to vector<22x30xf32>
    %46 = arith.subf %28, %45 : vector<22x30xf32>
    %47 = arith.mulf %46, %46 : vector<22x30xf32>
    %cst_14 = arith.constant dense<0.000000e+00> : vector<30xf32>
    %48 = vector.multi_reduction <add>, %47, %cst_14 [0] : vector<22x30xf32> to vector<30xf32>
    %49 = vector.shape_cast %48 : vector<30xf32> to vector<1x30xf32>
    %50 = arith.addf %44, %49 : vector<1x30xf32>
    %cst_15 = arith.constant 4.400000e+01 : f32
    %51 = vector.broadcast %cst_15 : f32 to vector<1x30xf32>
    %52 = arith.divf %50, %51 : vector<1x30xf32>
    %cst_16 = arith.constant 9.99999974E-6 : f32
    %53 = vector.broadcast %cst_16 : f32 to vector<1x30xf32>
    %54 = arith.addf %52, %53 : vector<1x30xf32>
    %55 = math.rsqrt %54 : vector<1x30xf32>
    %56 = arith.mulf %55, %2 : vector<1x30xf32>
    %57 = arith.mulf %37, %56 : vector<1x30xf32>
    %58 = arith.subf %3, %57 : vector<1x30xf32>
    %59 = vector.shape_cast %56 : vector<1x30xf32> to vector<1x30xf32>
    %60 = vector.broadcast %59 : vector<1x30xf32> to vector<22x30xf32>
    %61 = vector.shape_cast %58 : vector<1x30xf32> to vector<1x30xf32>
    %62 = vector.broadcast %61 : vector<1x30xf32> to vector<22x30xf32>
    %63 = arith.mulf %25, %60 : vector<22x30xf32>
    %64 = arith.addf %63, %62 : vector<22x30xf32>
    %c0_17 = arith.constant 0 : index
    %c0_18 = arith.constant 0 : index
    %65 = vector.load %arg4[%c0_17, %c0_18] : memref<64x30xf32, #tpu.memory_space<vmem>>, vector<22x30xf32>
    tpu.vector_store %arg4[%c0_17, %c0_18], %64 {strides = array<i32>} : memref<64x30xf32, #tpu.memory_space<vmem>>, vector<22x30xf32>,
    %66 = arith.mulf %28, %60 : vector<22x30xf32>
    %67 = arith.addf %66, %62 : vector<22x30xf32>
    %c24 = arith.constant 24 : index
    %c0_19 = arith.constant 0 : index
    %68 = vector.load %arg4[%c24, %c0_19] : memref<64x30xf32, #tpu.memory_space<vmem>>, vector<22x30xf32>
    tpu.vector_store %arg4[%c24, %c0_19], %67 {strides = array<i32>} : memref<64x30xf32, #tpu.memory_space<vmem>>, vector<22x30xf32>,
    %c0_20 = arith.constant 0 : index
    %c0_21 = arith.constant 0 : index
    %69 = tpu.strided_load %arg4[%c0_20, %c0_21] {strides = array<i32: 2, 1>} : memref<64x30xf32, #tpu.memory_space<vmem>>, vector<16x30xf32>
    %c1 = arith.constant 1 : index
    %c0_22 = arith.constant 0 : index
    %70 = tpu.strided_load %arg4[%c1, %c0_22] {strides = array<i32: 2, 1>} : memref<64x30xf32, #tpu.memory_space<vmem>>, vector<16x30xf32>
    %c2 = arith.constant 2 : index
    %c0_23 = arith.constant 0 : index
    %71 = tpu.strided_load %arg4[%c2, %c0_23] {strides = array<i32: 2, 1>} : memref<64x30xf32, #tpu.memory_space<vmem>>, vector<16x30xf32>
    %c3 = arith.constant 3 : index
    %c0_24 = arith.constant 0 : index
    %72 = tpu.strided_load %arg4[%c3, %c0_24] {strides = array<i32: 2, 1>} : memref<64x30xf32, #tpu.memory_space<vmem>>, vector<16x30xf32>
    %73 = tpu.concatenate %69, %70, %71 in 1 : vector<16x30xf32>, vector<16x30xf32>, vector<16x30xf32> -> vector<16x90xf32>
    %74 = tpu.concatenate %70, %71, %72 in 1 : vector<16x30xf32>, vector<16x30xf32>, vector<16x30xf32> -> vector<16x90xf32>
    %c24_25 = arith.constant 24 : index
    %c0_26 = arith.constant 0 : index
    %75 = tpu.strided_load %arg4[%c24_25, %c0_26] {strides = array<i32: 2, 1>} : memref<64x30xf32, #tpu.memory_space<vmem>>, vector<16x30xf32>
    %c25 = arith.constant 25 : index
    %c0_27 = arith.constant 0 : index
    %76 = tpu.strided_load %arg4[%c25, %c0_27] {strides = array<i32: 2, 1>} : memref<64x30xf32, #tpu.memory_space<vmem>>, vector<16x30xf32>
    %c26 = arith.constant 26 : index
    %c0_28 = arith.constant 0 : index
    %77 = tpu.strided_load %arg4[%c26, %c0_28] {strides = array<i32: 2, 1>} : memref<64x30xf32, #tpu.memory_space<vmem>>, vector<16x30xf32>
    %c27 = arith.constant 27 : index
    %c0_29 = arith.constant 0 : index
    %78 = tpu.strided_load %arg4[%c27, %c0_29] {strides = array<i32: 2, 1>} : memref<64x30xf32, #tpu.memory_space<vmem>>, vector<16x30xf32>
    %79 = tpu.concatenate %75, %76, %77 in 1 : vector<16x30xf32>, vector<16x30xf32>, vector<16x30xf32> -> vector<16x90xf32>
    %80 = tpu.concatenate %76, %77, %78 in 1 : vector<16x30xf32>, vector<16x30xf32>, vector<16x30xf32> -> vector<16x90xf32>
    %81 = tpu.concatenate %73, %74, %79, %80 in 0 : vector<16x90xf32>, vector<16x90xf32>, vector<16x90xf32>, vector<16x90xf32> -> vector<64x90xf32>
    %cst_30 = arith.constant dense<0.000000e+00> : vector<64x20xf32>
    %82 = tpu.matmul %81, %14, %cst_30 {dimension_numbers = #tpu.dot_dimension_numbers<[1], [0], [0], [1], [0, 0, 1, 1], [], []>} : vector<64x90xf32>, vector<90x20xf32>, vector<64x20xf32> -> vector<64x20xf32>
    %83 = vector.broadcast %4 : vector<1x20xf32> to vector<64x20xf32>
    %84 = arith.addf %82, %83 : vector<64x20xf32>
    %cst_31 = arith.constant 0.000000e+00 : f32
    %85 = vector.broadcast %cst_31 : f32 to vector<64x20xf32>
    %86 = arith.maximumf %84, %85 : vector<64x20xf32>
    %87 = vector.extract_strided_slice %86 {offsets = [0, 0], sizes = [10, 20], strides = [1, 1]} : vector<64x20xf32> to vector<10x20xf32>
    %88 = vector.extract_strided_slice %86 {offsets = [16, 0], sizes = [10, 20], strides = [1, 1]} : vector<64x20xf32> to vector<10x20xf32>
    %89 = arith.maximumf %87, %88 : vector<10x20xf32>
    %90 = vector.extract_strided_slice %86 {offsets = [32, 0], sizes = [10, 20], strides = [1, 1]} : vector<64x20xf32> to vector<10x20xf32>
    %91 = vector.extract_strided_slice %86 {offsets = [48, 0], sizes = [10, 20], strides = [1, 1]} : vector<64x20xf32> to vector<10x20xf32>
    %92 = arith.maximumf %90, %91 : vector<10x20xf32>
    %cst_32 = arith.constant 0.000000e+00 : f32
    %93 = vector.broadcast %cst_32 : f32 to vector<1x20xf32>
    %cst_33 = arith.constant dense<0.000000e+00> : vector<20xf32>
    %94 = vector.multi_reduction <add>, %89, %cst_33 [0] : vector<10x20xf32> to vector<20xf32>
    %95 = vector.shape_cast %94 : vector<20xf32> to vector<1x20xf32>
    %96 = arith.addf %93, %95 : vector<1x20xf32>
    %cst_34 = arith.constant dense<0.000000e+00> : vector<20xf32>
    %97 = vector.multi_reduction <add>, %92, %cst_34 [0] : vector<10x20xf32> to vector<20xf32>
    %98 = vector.shape_cast %97 : vector<20xf32> to vector<1x20xf32>
    %99 = arith.addf %96, %98 : vector<1x20xf32>
    %cst_35 = arith.constant 2.000000e+01 : f32
    %100 = vector.broadcast %cst_35 : f32 to vector<1x20xf32>
    %101 = arith.divf %99, %100 : vector<1x20xf32>
    %cst_36 = arith.constant 0.000000e+00 : f32
    %102 = vector.broadcast %cst_36 : f32 to vector<1x20xf32>
    %103 = vector.broadcast %101 : vector<1x20xf32> to vector<10x20xf32>
    %104 = arith.subf %89, %103 : vector<10x20xf32>
    %105 = arith.mulf %104, %104 : vector<10x20xf32>
    %cst_37 = arith.constant dense<0.000000e+00> : vector<20xf32>
    %106 = vector.multi_reduction <add>, %105, %cst_37 [0] : vector<10x20xf32> to vector<20xf32>
    %107 = vector.shape_cast %106 : vector<20xf32> to vector<1x20xf32>
    %108 = arith.addf %102, %107 : vector<1x20xf32>
    %109 = vector.broadcast %101 : vector<1x20xf32> to vector<10x20xf32>
    %110 = arith.subf %92, %109 : vector<10x20xf32>
    %111 = arith.mulf %110, %110 : vector<10x20xf32>
    %cst_38 = arith.constant dense<0.000000e+00> : vector<20xf32>
    %112 = vector.multi_reduction <add>, %111, %cst_38 [0] : vector<10x20xf32> to vector<20xf32>
    %113 = vector.shape_cast %112 : vector<20xf32> to vector<1x20xf32>
    %114 = arith.addf %108, %113 : vector<1x20xf32>
    %cst_39 = arith.constant 2.000000e+01 : f32
    %115 = vector.broadcast %cst_39 : f32 to vector<1x20xf32>
    %116 = arith.divf %114, %115 : vector<1x20xf32>
    %cst_40 = arith.constant 9.99999974E-6 : f32
    %117 = vector.broadcast %cst_40 : f32 to vector<1x20xf32>
    %118 = arith.addf %116, %117 : vector<1x20xf32>
    %119 = math.rsqrt %118 : vector<1x20xf32>
    %120 = arith.mulf %119, %5 : vector<1x20xf32>
    %121 = arith.mulf %101, %120 : vector<1x20xf32>
    %122 = arith.subf %6, %121 : vector<1x20xf32>
    %123 = vector.shape_cast %120 : vector<1x20xf32> to vector<1x20xf32>
    %124 = vector.broadcast %123 : vector<1x20xf32> to vector<10x20xf32>
    %125 = vector.shape_cast %122 : vector<1x20xf32> to vector<1x20xf32>
    %126 = vector.broadcast %125 : vector<1x20xf32> to vector<10x20xf32>
    %127 = arith.mulf %89, %124 : vector<10x20xf32>
    %128 = arith.addf %127, %126 : vector<10x20xf32>
    %c0_41 = arith.constant 0 : index
    %c0_42 = arith.constant 0 : index
    %129 = vector.load %arg5[%c0_41, %c0_42] : memref<40x20xf32, #tpu.memory_space<vmem>>, vector<10x20xf32>
    tpu.vector_store %arg5[%c0_41, %c0_42], %128 {strides = array<i32>} : memref<40x20xf32, #tpu.memory_space<vmem>>, vector<10x20xf32>,
    %130 = arith.mulf %92, %124 : vector<10x20xf32>
    %131 = arith.addf %130, %126 : vector<10x20xf32>
    %c16 = arith.constant 16 : index
    %c0_43 = arith.constant 0 : index
    %132 = vector.load %arg5[%c16, %c0_43] : memref<40x20xf32, #tpu.memory_space<vmem>>, vector<10x20xf32>
    tpu.vector_store %arg5[%c16, %c0_43], %131 {strides = array<i32>} : memref<40x20xf32, #tpu.memory_space<vmem>>, vector<10x20xf32>,
    %c0_44 = arith.constant 0 : index
    %c0_45 = arith.constant 0 : index
    %133 = tpu.strided_load %arg5[%c0_44, %c0_45] {strides = array<i32: 2, 1>} : memref<40x20xf32, #tpu.memory_space<vmem>>, vector<8x20xf32>
    %c1_46 = arith.constant 1 : index
    %c0_47 = arith.constant 0 : index
    %134 = tpu.strided_load %arg5[%c1_46, %c0_47] {strides = array<i32: 2, 1>} : memref<40x20xf32, #tpu.memory_space<vmem>>, vector<8x20xf32>
    %c2_48 = arith.constant 2 : index
    %c0_49 = arith.constant 0 : index
    %135 = tpu.strided_load %arg5[%c2_48, %c0_49] {strides = array<i32: 2, 1>} : memref<40x20xf32, #tpu.memory_space<vmem>>, vector<8x20xf32>
    %c3_50 = arith.constant 3 : index
    %c0_51 = arith.constant 0 : index
    %136 = tpu.strided_load %arg5[%c3_50, %c0_51] {strides = array<i32: 2, 1>} : memref<40x20xf32, #tpu.memory_space<vmem>>, vector<8x20xf32>
    %137 = tpu.concatenate %133, %134, %135 in 1 : vector<8x20xf32>, vector<8x20xf32>, vector<8x20xf32> -> vector<8x60xf32>
    %138 = tpu.concatenate %134, %135, %136 in 1 : vector<8x20xf32>, vector<8x20xf32>, vector<8x20xf32> -> vector<8x60xf32>
    %c16_52 = arith.constant 16 : index
    %c0_53 = arith.constant 0 : index
    %139 = tpu.strided_load %arg5[%c16_52, %c0_53] {strides = array<i32: 2, 1>} : memref<40x20xf32, #tpu.memory_space<vmem>>, vector<8x20xf32>
    %c17 = arith.constant 17 : index
    %c0_54 = arith.constant 0 : index
    %140 = tpu.strided_load %arg5[%c17, %c0_54] {strides = array<i32: 2, 1>} : memref<40x20xf32, #tpu.memory_space<vmem>>, vector<8x20xf32>
    %c18 = arith.constant 18 : index
    %c0_55 = arith.constant 0 : index
    %141 = tpu.strided_load %arg5[%c18, %c0_55] {strides = array<i32: 2, 1>} : memref<40x20xf32, #tpu.memory_space<vmem>>, vector<8x20xf32>
    %c19 = arith.constant 19 : index
    %c0_56 = arith.constant 0 : index
    %142 = tpu.strided_load %arg5[%c19, %c0_56] {strides = array<i32: 2, 1>} : memref<40x20xf32, #tpu.memory_space<vmem>>, vector<8x20xf32>
    %143 = tpu.concatenate %139, %140, %141 in 1 : vector<8x20xf32>, vector<8x20xf32>, vector<8x20xf32> -> vector<8x60xf32>
    %144 = tpu.concatenate %140, %141, %142 in 1 : vector<8x20xf32>, vector<8x20xf32>, vector<8x20xf32> -> vector<8x60xf32>
    %145 = tpu.concatenate %137, %138, %143, %144 in 0 : vector<8x60xf32>, vector<8x60xf32>, vector<8x60xf32>, vector<8x60xf32> -> vector<32x60xf32>
    %cst_57 = arith.constant dense<0.000000e+00> : vector<32x10xf32>
    %146 = tpu.matmul %145, %16, %cst_57 {dimension_numbers = #tpu.dot_dimension_numbers<[1], [0], [0], [1], [0, 0, 1, 1], [], []>} : vector<32x60xf32>, vector<60x10xf32>, vector<32x10xf32> -> vector<32x10xf32>
    %147 = vector.broadcast %7 : vector<1x10xf32> to vector<32x10xf32>
    %148 = arith.addf %146, %147 : vector<32x10xf32>
    %cst_58 = arith.constant 0.000000e+00 : f32
    %149 = vector.broadcast %cst_58 : f32 to vector<32x10xf32>
    %150 = arith.maximumf %148, %149 : vector<32x10xf32>
    %151 = vector.extract_strided_slice %150 {offsets = [0, 0], sizes = [4, 10], strides = [1, 1]} : vector<32x10xf32> to vector<4x10xf32>
    %152 = vector.extract_strided_slice %150 {offsets = [8, 0], sizes = [4, 10], strides = [1, 1]} : vector<32x10xf32> to vector<4x10xf32>
    %153 = arith.maximumf %151, %152 : vector<4x10xf32>
    %154 = vector.extract_strided_slice %150 {offsets = [16, 0], sizes = [4, 10], strides = [1, 1]} : vector<32x10xf32> to vector<4x10xf32>
    %155 = vector.extract_strided_slice %150 {offsets = [24, 0], sizes = [4, 10], strides = [1, 1]} : vector<32x10xf32> to vector<4x10xf32>
    %156 = arith.maximumf %154, %155 : vector<4x10xf32>
    %cst_59 = arith.constant 0.000000e+00 : f32
    %157 = vector.broadcast %cst_59 : f32 to vector<1x10xf32>
    %cst_60 = arith.constant dense<0.000000e+00> : vector<10xf32>
    %158 = vector.multi_reduction <add>, %153, %cst_60 [0] : vector<4x10xf32> to vector<10xf32>
    %159 = vector.shape_cast %158 : vector<10xf32> to vector<1x10xf32>
    %160 = arith.addf %157, %159 : vector<1x10xf32>
    %cst_61 = arith.constant dense<0.000000e+00> : vector<10xf32>
    %161 = vector.multi_reduction <add>, %156, %cst_61 [0] : vector<4x10xf32> to vector<10xf32>
    %162 = vector.shape_cast %161 : vector<10xf32> to vector<1x10xf32>
    %163 = arith.addf %160, %162 : vector<1x10xf32>
    %cst_62 = arith.constant 8.000000e+00 : f32
    %164 = vector.broadcast %cst_62 : f32 to vector<1x10xf32>
    %165 = arith.divf %163, %164 : vector<1x10xf32>
    %cst_63 = arith.constant 0.000000e+00 : f32
    %166 = vector.broadcast %cst_63 : f32 to vector<1x10xf32>
    %167 = vector.broadcast %165 : vector<1x10xf32> to vector<4x10xf32>
    %168 = arith.subf %153, %167 : vector<4x10xf32>
    %169 = arith.mulf %168, %168 : vector<4x10xf32>
    %cst_64 = arith.constant dense<0.000000e+00> : vector<10xf32>
    %170 = vector.multi_reduction <add>, %169, %cst_64 [0] : vector<4x10xf32> to vector<10xf32>
    %171 = vector.shape_cast %170 : vector<10xf32> to vector<1x10xf32>
    %172 = arith.addf %166, %171 : vector<1x10xf32>
    %173 = vector.broadcast %165 : vector<1x10xf32> to vector<4x10xf32>
    %174 = arith.subf %156, %173 : vector<4x10xf32>
    %175 = arith.mulf %174, %174 : vector<4x10xf32>
    %cst_65 = arith.constant dense<0.000000e+00> : vector<10xf32>
    %176 = vector.multi_reduction <add>, %175, %cst_65 [0] : vector<4x10xf32> to vector<10xf32>
    %177 = vector.shape_cast %176 : vector<10xf32> to vector<1x10xf32>
    %178 = arith.addf %172, %177 : vector<1x10xf32>
    %cst_66 = arith.constant 8.000000e+00 : f32
    %179 = vector.broadcast %cst_66 : f32 to vector<1x10xf32>
    %180 = arith.divf %178, %179 : vector<1x10xf32>
    %cst_67 = arith.constant 9.99999974E-6 : f32
    %181 = vector.broadcast %cst_67 : f32 to vector<1x10xf32>
    %182 = arith.addf %180, %181 : vector<1x10xf32>
    %183 = math.rsqrt %182 : vector<1x10xf32>
    %184 = arith.mulf %183, %8 : vector<1x10xf32>
    %185 = arith.mulf %165, %184 : vector<1x10xf32>
    %186 = arith.subf %9, %185 : vector<1x10xf32>
    %187 = vector.broadcast %184 : vector<1x10xf32> to vector<4x10xf32>
    %188 = arith.mulf %10, %187 : vector<4x10xf32>
    %189 = vector.broadcast %186 : vector<1x10xf32> to vector<4x10xf32>
    %190 = arith.mulf %10, %189 : vector<4x10xf32>
    %cst_68 = arith.constant dense<0.000000e+00> : vector<4xf32>
    %191 = vector.multi_reduction <add>, %190, %cst_68 [1] : vector<4x10xf32> to vector<4xf32>
    %192 = vector.shape_cast %191 : vector<4xf32> to vector<4x1xf32>
    %cst_69 = arith.constant dense<0.000000e+00> : vector<1xf32>
    %193 = vector.multi_reduction <add>, %192, %cst_69 [0] : vector<4x1xf32> to vector<1xf32>
    %194 = vector.shape_cast %193 : vector<1xf32> to vector<1x1xf32>
    %195 = arith.addf %194, %11 : vector<1x1xf32>
    %196 = arith.mulf %153, %188 : vector<4x10xf32>
    %cst_70 = arith.constant dense<0.000000e+00> : vector<4xf32>
    %197 = vector.multi_reduction <add>, %196, %cst_70 [1] : vector<4x10xf32> to vector<4xf32>
    %198 = vector.shape_cast %197 : vector<4xf32> to vector<4x1xf32>
    %cst_71 = arith.constant dense<0.000000e+00> : vector<1xf32>
    %199 = vector.multi_reduction <add>, %198, %cst_71 [0] : vector<4x1xf32> to vector<1xf32>
    %200 = vector.shape_cast %199 : vector<1xf32> to vector<1x1xf32>
    %201 = arith.mulf %156, %188 : vector<4x10xf32>
    %cst_72 = arith.constant dense<0.000000e+00> : vector<4xf32>
    %202 = vector.multi_reduction <add>, %201, %cst_72 [1] : vector<4x10xf32> to vector<4xf32>
    %203 = vector.shape_cast %202 : vector<4xf32> to vector<4x1xf32>
    %cst_73 = arith.constant dense<0.000000e+00> : vector<1xf32>
    %204 = vector.multi_reduction <add>, %203, %cst_73 [0] : vector<4x1xf32> to vector<1xf32>
    %205 = vector.shape_cast %204 : vector<1xf32> to vector<1x1xf32>
    %206 = tpu.concatenate %200, %205 in 0 : vector<1x1xf32>, vector<1x1xf32> -> vector<2x1xf32>
    %207 = vector.broadcast %195 : vector<1x1xf32> to vector<2x1xf32>
    %208 = arith.addf %206, %207 : vector<2x1xf32>
    %cst_74 = arith.constant 0.000000e+00 : f32
    %209 = vector.broadcast %cst_74 : f32 to vector<2x1xf32>
    %210 = arith.subf %209, %208 : vector<2x1xf32>
    %211 = math.exp %210 : vector<2x1xf32>
    %cst_75 = arith.constant 1.000000e+00 : f32
    %212 = vector.broadcast %cst_75 : f32 to vector<2x1xf32>
    %213 = arith.addf %212, %211 : vector<2x1xf32>
    %214 = tpu.reciprocal %213 {approx = true} : vector<2x1xf32> -> vector<2x1xf32>
    %c0_76 = arith.constant 0 : index
    %c0_77 = arith.constant 0 : index
    %215 = vector.load %arg3[%c0_76, %c0_77] : memref<2x1xf32, #tpu.memory_space<vmem>>, vector<2x1xf32>
    tpu.vector_store %arg3[%c0_76, %c0_77], %214 {strides = array<i32>} : memref<2x1xf32, #tpu.memory_space<vmem>>, vector<2x1xf32>,
    return
  }
}

</mosaic_0001>

<bundles_post_ra>
// kernel: tpu_custom_call.1
= control target key start
LH: loop header
LB: loop body
LE: loop exit
PB: predicated region body
PF: predicated region fallthrough
CT: control target
= control target key end

     0   :  { %vm90_vm0 = vcmask 1042432   ;;  %vm53_vm1 = vcmask 23552   ;;  %v49_v13 = vlaneseq  ;;  %vm473_vm2 = vcmask 1041408   ;;  %s1120_s9 = smov 60   ;;  %s1121_s10 = smov 30   ;;  %s1414_s1 = inlined_call_operand.vmem [shape: f32[168,30], index: 1, kind: input, shape index: {}]   ;;  %s1415_s0 = inlined_call_operand.vmem [shape: f32[96,3], index: 0, kind: input, shape index: {}]   ;;  %s1416_s2 = inlined_call_operand.vmem [shape: f32[16,30], index: 2, kind: input, shape index: {}]   ;;  %s1417_s3 = inlined_call_operand.vmem [shape: f32[2,1], index: 3, kind: output, shape index: {}]  }
   0x1   :  { %v16_v0 = vld [vmem:[%s1414_s1] sm:$0x7]  ;;  %v38_v2 = vld [vmem:[%s1415_s0 + $0x8] sm:$0xff]  ;;  %v39_v3 = vld [vmem:[%s1415_s0 + $0x10] sm:$0xff]  ;;  %vm237_vm3 = vcmask 244736   ;;  %vm241_vm4 = vcmask 242688  }
   0x2   :  { %v37_v1 = vld [vmem:[%s1415_s0] sm:$0xff]  ;;  %1028 = vmatprep.subr.msk.mxu0 %vm90_vm0, %v16_v0  ;;  %v40_v4 = vld [vmem:[%s1415_s0 + $0x18] sm:$0xff]  ;;  %v42_v6 = vld [vmem:[%s1415_s0 + $0x28] sm:$0xff]  ;;  %v1195_v14 = vshrl.u32 %v49_v13, 7  ;;  %vm369_vm5 = vcmask 490496   ;;  %vm448_vm6 = vcmask 736256  }
   0x3   :  { %1030 = vmatprep.mubr.msk.f32.mxu0 %vm53_vm1, %v37_v1  ;;  %1029 = vmatpush3.msk.msra.mxu0 %vm90_vm0, %v16_v0  ;;  %v41_v5 = vld [vmem:[%s1415_s0 + $0x20] sm:$0xff]  ;;  %v43_v7 = vld [vmem:[%s1415_s0 + $0x30] sm:$0xff]  ;;  %v44_v8 = vld [vmem:[%s1415_s0 + $0x38] sm:$0xff]  ;;  %vm745_vm7 = vcmask 1043456   ;;  %vm594_vm8 = vcmask 162816   ;;  %vm596_vm9 = vcmask 156672  }
   0x4   :  { %1031 = vmatmul.mubr.msk.f32.vlgmr.msra.gmra.mxu0 %vm53_vm1, %v38_v2  ;;  %v45_v9 = vld [vmem:[%s1415_s0 + $0x40] sm:$0xff]  ;;  %v46_v10 = vld [vmem:[%s1415_s0 + $0x48] sm:$0xff]  ;;  %v47_v11 = vld [vmem:[%s1415_s0 + $0x50] sm:$0xff]  ;;  %v51_v15 = vsub.s32 0, %v1195_v14  ;;  %s1122_s26 = smov 40   ;;  %s1123_s27 = smov 20  }
   0x5   :  { %1033 = vmatprep.mubr.msk.f32.mxu0 %vm53_vm1, %v39_v3  ;;  %v48_v12 = vld [vmem:[%s1415_s0 + $0x58] sm:$0xff]  ;;  %v1201_v16 = vld [vmem:[%s1416_s2] sm:$0xff]  ;;  %v26_v41 = vld [vmem:[%s1414_s1 + $0x50] sm:$0xff]  ;;  %vm691_vm10 = vcmask 326656   ;;  %vm840_vm11 = vcmask 76800   ;;  %vm898_vm12 = vcmask 77825  }
   0x6   :  { %v52_v19 = vrot.slane %v1201_v16, %v51_v15  ;;  %v28_v34 = vld [vmem:[%s1414_s1 + $0x60] sm:$0x3]  ;;  %v27_v35 = vld [vmem:[%s1414_s1 + $0x58] sm:$0xff]  ;;  %v25_v45 = vld [vmem:[%s1414_s1 + $0x48] sm:$0xff]  ;;  %vm938_vm13 = vcmask 1040384   ;;  %vm950_vm14 = vcmask 1024  }
   0x7   :  { %1048 = vmatprep.subr.msk.mxu1 %vm473_vm2, %v28_v34  ;;  %v24_v51 = vld [vmem:[%s1414_s1 + $0x40] sm:$0xff]  ;;  %v23_v56 = vld [vmem:[%s1414_s1 + $0x38] sm:$0xff]  ;;  %v22_v62 = vld [vmem:[%s1414_s1 + $0x30] sm:$0xff] }
   0x8   :  { %1034 = vmatmul.mubr.msk.f32.gmra.mxu0 %vm53_vm1, %v40_v4  ;;  %1049 = vmatpush3.msk.msra.mxu1 %vm473_vm2, %v28_v34  ;;  %v21_v3 = vld [vmem:[%s1414_s1 + $0x28] sm:$0xff] }
   0x9   :  { %1036 = vmatprep.mubr.msk.f32.mxu0 %vm53_vm1, %v41_v5  ;;  %1050 = vmatprep.subr.mxu1 %v27_v35 }
   0xa   :  { %1051 = vmatpush3.msra.mxu1 %v27_v35 }
   0xb   :  { %1052 = vmatprep.subr.mxu1 %v26_v41 }
   0xc   :  { %1037 = vmatmul.mubr.msk.f32.gmra.mxu0 %vm53_vm1, %v42_v6  ;;  %1053 = vmatpush3.msra.mxu1 %v26_v41 }
   0xd   :  { %1039 = vmatprep.mubr.msk.f32.mxu0 %vm53_vm1, %v43_v7  ;;  %1054 = vmatprep.subr.mxu1 %v25_v45 }
   0xe   :  { %1055 = vmatpush3.msra.mxu1 %v25_v45 }
   0xf   :  { %1056 = vmatprep.subr.mxu1 %v24_v51 }
  0x10   :  { %1040 = vmatmul.mubr.msk.f32.gmra.mxu0 %vm53_vm1, %v44_v8  ;;  %1057 = vmatpush3.msra.mxu1 %v24_v51  ;;  %v20_v8 = vld [vmem:[%s1414_s1 + $0x20] sm:$0xff] }
  0x11   :  { %1042 = vmatprep.mubr.msk.f32.mxu0 %vm53_vm1, %v45_v9  ;;  %1058 = vmatprep.subr.mxu1 %v23_v56 }
  0x12   :  { %1059 = vmatpush3.msra.mxu1 %v23_v56 }
  0x13   :  { %1060 = vmatprep.subr.mxu1 %v22_v62 }
  0x14   :  { %1043 = vmatmul.mubr.msk.f32.gmra.mxu0 %vm53_vm1, %v46_v10  ;;  %1061 = vmatpush3.msra.mxu1 %v22_v62 }
  0x15   :  { %1045 = vmatprep.mubr.msk.f32.mxu0 %vm53_vm1, %v47_v11  ;;  %1062 = vmatprep.subr.mxu1 %v21_v3 }
  0x16   :  { %1063 = vmatpush3.msra.mxu1 %v21_v3 }
  0x17   :  { %1064 = vmatprep.subr.mxu1 %v20_v8 }
  0x18   :  { %1046 = vmatmul.mubr.msk.f32.gmra.mxu0 %vm53_vm1, %v48_v12  ;;  %1065 = vmatpush3.msra.mxu1 %v20_v8 }
  0xc4   :  { %v1032_v17 = vpop.f32.mrf.mxu0 }
  0xc5   :  { %v166_v25 = vadd.f32 %v1032_v17, %v52_v19 }
  0xc6   :  { %v160_v18 = vpop.f32.mrf.mxu0 }
  0xc7   :  { %v161_v23 = vadd.f32 %v160_v18, %v52_v19  ;;  %v220_v36 = vmax.f32 %v166_v25, 0.0 }
  0xc8   :  { %v1035_v20 = vpop.f32.mrf.mxu0 }
  0xc9   :  { %v176_v21 = vadd.f32 %v1035_v20, %v52_v19  ;;  %v219_v30 = vmax.f32 %v161_v23, 0.0 }
  0xca   :  { %v170_v22 = vpop.f32.mrf.mxu0 }
  0xcb   :  { %v222_v26 = vmax.f32 %v176_v21, 0.0  ;;  %v171_v27 = vadd.f32 %v170_v22, %v52_v19 }
  0xcc   :  { %v1038_v24 = vpop.f32.mrf.mxu0 }
  0xcd   :  { %v186_v28 = vadd.f32 %v1038_v24, %v52_v19  ;;  %v1212_v37 = vmax.f32 %v219_v30, %v222_v26  ;;  %v221_v38 = vmax.f32 %v171_v27, 0.0 }
  0xce   :  { %v180_v29 = vpop.f32.mrf.mxu0 }
  0xcf   :  { %v224_v31 = vmax.f32 %v186_v28, 0.0  ;;  %v181_v32 = vadd.f32 %v180_v29, %v52_v19  ;;  %v238_v46 = vsel %vm237_vm3, %v1212_v37, 0.0 }
  0xd0   :  { %v1041_v33 = vpop.f32.mrf.mxu0 }
  0xd1   :  { %v223_v39 = vmax.f32 %v181_v32, 0.0  ;;  %v1217_v42 = vmax.f32 %v221_v38, %v224_v31  ;;  %v196_v57 = vadd.f32 %v1041_v33, %v52_v19 }
  0xd2   :  { %v190_v40 = vpop.f32.mrf.mxu0 }
  0xd3   :  { %v1219_v43 = vmax.f32 %v220_v36, %v223_v39  ;;  %v242_v52 = vsel %vm241_vm4, %v1217_v42, 0.0  ;;  %v191_v53 = vadd.f32 %v190_v40, %v52_v19  ;;  %v226_v4 = vmax.f32 %v196_v57, 0.0 }
  0xd4   :  { %v1044_v44 = vpop.f32.mrf.mxu0 }
  0xd5   :  { %v239_v47 = vsel %vm237_vm3, %v1219_v43, 0.0  ;;  %v206_v48 = vadd.f32 %v1044_v44, %v52_v19  ;;  %v225_v63 = vmax.f32 %v191_v53, 0.0 }
  0xd6   :  { %v240_v49 = vadd.f32 %v239_v47, %v238_v46  ;;  %v200_v50 = vpop.f32.mrf.mxu0 }
  0xd7   :  { %v228_v58 = vmax.f32 %v206_v48, 0.0  ;;  %v201_v59 = vadd.f32 %v200_v50, %v52_v19 }
  0xd8   :  { %v243_v54 = vadd.f32 %v242_v52, %v240_v49  ;;  %v1047_v55 = vpop.f32.mrf.mxu0 }
  0xd9   :  { %v216_v60 = vadd.f32 %v1047_v55, %v52_v19  ;;  %v1242_v5 = vmax.f32 %v225_v63, %v228_v58  ;;  %v227_v6 = vmax.f32 %v201_v59, 0.0 }
  0xda   :  { %v210_v61 = vpop.f32.mrf.mxu0  ;;  %v244_v2 = vrot.slane %v243_v54, 4 }
  0xdb   :  { %v230_v0 = vmax.f32 %v216_v60, 0.0  ;;  %v211_v1 = vadd.f32 %v210_v61, %v52_v19  ;;  %v251_v12 = vsel %vm237_vm3, %v1242_v5, 0.0 }
  0xdc   :  { %v245_v11 = vadd.f32 %v244_v2, %v243_v54 }
  0xdd   :  { %v229_v7 = vmax.f32 %v211_v1, 0.0  ;;  %v1247_v9 = vmax.f32 %v227_v6, %v230_v0 }
  0xde   :  { %v246_v19 = vrot.slane %v245_v11, 2 }
  0xdf   :  { %v1249_v10 = vmax.f32 %v226_v4, %v229_v7  ;;  %v254_v18 = vsel %vm241_vm4, %v1247_v9, 0.0 }
  0xe0   :  { %v247_v22 = vadd.f32 %v246_v19, %v245_v11 }
  0xe1   :  { %v252_v13 = vsel %vm237_vm3, %v1249_v10, 0.0 }
  0xe2   :  { %v253_v17 = vadd.f32 %v252_v13, %v251_v12  ;;  %v248_v25 = vrot.slane %v247_v22, 1  ;;  %v312_v12 = vsub.s32 1, %v1195_v14 }
  0xe4   :  { %v255_v20 = vadd.f32 %v254_v18, %v253_v17  ;;  %v249_v28 = vadd.f32 %v248_v25, %v247_v22 }
  0xe6   :  { %v256_v21 = vrot.slane %v255_v20, 4 }
  0xe8   :  { %v257_v23 = vadd.f32 %v256_v21, %v255_v20  ;;  %v316_v20 = vsub.s32 2, %v1195_v14 }
  0xea   :  { %v258_v24 = vrot.slane %v257_v23, 2 }
  0xec   :  { %v259_v26 = vadd.f32 %v258_v24, %v257_v23  ;;  %v19_v23 = vld [vmem:[%s1414_s1 + $0x18] sm:$0xff]  ;;  %v18_v24 = vld [vmem:[%s1414_s1 + $0x10] sm:$0xff] }
  0xed   :  { %1066 = vmatprep.subr.mxu1 %v19_v23 }
  0xee   :  { %v260_v27 = vrot.slane %v259_v26, 1  ;;  %1067 = vmatpush3.msra.mxu1 %v19_v23 }
  0xef   :  { %1068 = vmatprep.subr.mxu1 %v18_v24 }
  0xf0   :  { %v261_v29 = vadd.f32 %v260_v27, %v259_v26  ;;  %1069 = vmatpush3.msra.mxu1 %v18_v24 }
  0xf2   :  { %v262_v30 = vadd.f32 %v261_v29, %v249_v28 }
  0xf4   :  { %v264_v31 = vmul.f32 0.022727273, %v262_v30 }
  0xf6   :  { %v265_v32 = vsub.f32 %v1212_v37, %v264_v31  ;;  %v266_v33 = vsub.f32 %v1219_v43, %v264_v31  ;;  %v267_v34 = vsub.f32 %v1217_v42, %v264_v31  ;;  %v283_v35 = vsub.f32 %v1242_v5, %v264_v31 }
  0xf7   :  { %v284_v36 = vsub.f32 %v1249_v10, %v264_v31  ;;  %v285_v38 = vsub.f32 %v1247_v9, %v264_v31 }
  0xf8   :  { %v268_v39 = vmul.f32 %v265_v32, %v265_v32  ;;  %v269_v40 = vmul.f32 %v266_v33, %v266_v33  ;;  %v270_v41 = vmul.f32 %v267_v34, %v267_v34  ;;  %v286_v44 = vmul.f32 %v283_v35, %v283_v35 }
  0xf9   :  { %v287_v45 = vmul.f32 %v284_v36, %v284_v36  ;;  %v288_v46 = vmul.f32 %v285_v38, %v285_v38 }
  0xfa   :  { %v271_v47 = vsel %vm237_vm3, %v268_v39, 0.0  ;;  %v272_v48 = vsel %vm237_vm3, %v269_v40, 0.0  ;;  %v289_v49 = vsel %vm237_vm3, %v286_v44, 0.0  ;;  %v274_v52 = vsel %vm241_vm4, %v270_v41, 0.0 }
  0xfb   :  { %v273_v50 = vadd.f32 %v272_v48, %v271_v47  ;;  %v290_v51 = vsel %vm237_vm3, %v287_v45, 0.0  ;;  %v292_v55 = vsel %vm241_vm4, %v288_v46, 0.0 }
  0xfc   :  { %v291_v53 = vadd.f32 %v290_v51, %v289_v49 }
  0xfd   :  { %v275_v54 = vadd.f32 %v274_v52, %v273_v50 }
  0xfe   :  { %v293_v56 = vadd.f32 %v292_v55, %v291_v53 }
  0xff   :  { %v276_v57 = vrot.slane %v275_v54, 4 }
 0x100   :  { %v294_v58 = vrot.slane %v293_v56, 4 }
 0x101   :  { %v277_v59 = vadd.f32 %v276_v57, %v275_v54 }
 0x102   :  { %v295_v60 = vadd.f32 %v294_v58, %v293_v56 }
 0x103   :  { %v278_v61 = vrot.slane %v277_v59, 2 }
 0x104   :  { %v296_v62 = vrot.slane %v295_v60, 2 }
 0x105   :  { %v279_v63 = vadd.f32 %v278_v61, %v277_v59 }
 0x106   :  { %v297_v0 = vadd.f32 %v296_v62, %v295_v60 }
 0x107   :  { %v280_v1 = vrot.slane %v279_v63, 1 }
 0x108   :  { %v298_v2 = vrot.slane %v297_v0, 1 }
 0x109   :  { %v281_v3 = vadd.f32 %v280_v1, %v279_v63 }
 0x10a   :  { %v299_v4 = vadd.f32 %v298_v2, %v297_v0 }
 0x10c   :  { %v300_v6 = vadd.f32 %v299_v4, %v281_v3 }
 0x10e   :  { %v301_v7 = vmul.f32 0.022727273, %v300_v6 }
 0x110   :  { %v302_v8 = vadd.f32 1e-05, %v301_v7 }
 0x112   :  { %1110 = vrsqrt.f32 %v302_v8 }
 0x11f   :  { %v1111_v11 = vpop.eup %1110 }
 0x120   :  { %v304_v13 = vmul.f32 %v1111_v11, %v1201_v16 }
 0x122   :  { %v305_v17 = vmul.f32 %v304_v13, %v264_v31  ;;  %v313_v18 = vrot.slane %v304_v13, %v312_v12 }
 0x124   :  { %v307_v19 = vrot.slane %v305_v17, 7  ;;  %v328_v22 = vmul.f32 %v313_v18, %v1249_v10  ;;  %v318_v26 = vmul.f32 %v313_v18, %v1212_v37  ;;  %v319_v27 = vmul.f32 %v313_v18, %v1219_v43  ;;  %v17_v37 = vld [vmem:[%s1414_s1 + $0x8] sm:$0xff] }
 0x125   :  { %v320_v28 = vmul.f32 %v313_v18, %v1217_v42  ;;  %v327_v29 = vmul.f32 %v313_v18, %v1242_v5  ;;  %v329_v10 = vmul.f32 %v313_v18, %v1247_v9  ;;  %1070 = vmatprep.subr.mxu1 %v17_v37 }
 0x126   :  { %v309_v21 = vsub.f32 %v1201_v16, %v307_v19  ;;  %1071 = vmatpush3.msra.mxu1 %v17_v37 }
 0x128   :  { %v317_v25 = vrot.slane %v309_v21, %v316_v20 }
 0x12a   :  { %v331_v30 = vadd.f32 %v328_v22, %v317_v25  ;;  %v321_v31 = vadd.f32 %v318_v26, %v317_v25  ;;  %v322_v32 = vadd.f32 %v319_v27, %v317_v25  ;;  %v323_v33 = vadd.f32 %v320_v28, %v317_v25  ;;  %v35_v26 = vld [vmem:[%s1414_s1 + $0x98] sm:$0xff]  ;;  %v34_v27 = vld [vmem:[%s1414_s1 + $0x90] sm:$0xff]  ;;  %v33_v28 = vld [vmem:[%s1414_s1 + $0x88] sm:$0xff] }
 0x12b   :  { %v330_v34 = vadd.f32 %v327_v29, %v317_v25  ;;  %v332_v35 = vadd.f32 %v329_v10, %v317_v25  ;;  %v36_v25 = vld [vmem:[%s1414_s1 + $0xa0] sm:$0xf] }
 0x12c   :  { %334 = vst.msk [vmem:[#allocation2 + $0x20] sm:$0xff] %vm237_vm3, %v331_v30  ;;  %324 = vst.msk [vmem:[#allocation2] sm:$0xff] %vm237_vm3, %v321_v31  ;;  %1084 = vmatprep.subr.msk.mxu0 %vm745_vm7, %v36_v25  ;;  %v32_v29 = vld [vmem:[%s1414_s1 + $0x80] sm:$0xff]  ;;  %v446_v30 = vsub.s32 3, %v1195_v14 }
 0x12d   :  { %325 = vst.msk [vmem:[#allocation2 + $0x8] sm:$0xff] %vm237_vm3, %v322_v32  ;;  %333 = vst.msk [vmem:[#allocation2 + $0x18] sm:$0xff] %vm237_vm3, %v330_v34  ;;  %1085 = vmatpush3.msk.msra.mxu0 %vm745_vm7, %v36_v25 }
 0x12e   :  { %326 = vst.msk [vmem:[#allocation2 + $0x10] sm:$0x3f] %vm241_vm4, %v323_v33  ;;  %335 = vst.msk [vmem:[#allocation2 + $0x28] sm:$0x3f] %vm241_vm4, %v332_v35  ;;  %1086 = vmatprep.subr.mxu0 %v35_v26  ;;  %v447_v32 = vrot.slane %v1201_v16, %v446_v30 }
 0x12f   :  { %1087 = vmatpush3.msra.mxu0 %v35_v26 }
 0x130   :  { %1088 = vmatprep.subr.mxu0 %v34_v27 }
 0x131   :  { %1089 = vmatpush3.msra.mxu0 %v34_v27 }
 0x132   :  { %1090 = vmatprep.subr.mxu0 %v33_v28 }
 0x133   :  { %1091 = vmatpush3.msra.mxu0 %v33_v28 }
 0x134   :  { %v340_v43 = vld [vmem:[#allocation2 + $0x1] ss:$2 sm:$0xff]  ;;  %v336_v49 = vld [vmem:[#allocation2] ss:$2 sm:$0xff]  ;;  %1092 = vmatprep.subr.mxu0 %v32_v29 }
 0x135   :  { %v344_v42 = vld [vmem:[#allocation2 + $0x2] ss:$2 sm:$0xff]  ;;  %353 = vrot.lane.b32.xlu0 %v340_v43, %s1121_s10  ;;  %v346_v5 = vld [vmem:[#allocation2 + $0x12] ss:$2 sm:$0xff]  ;;  %v342_v9 = vld [vmem:[#allocation2 + $0x11] ss:$2 sm:$0xff]  ;;  %1093 = vmatpush3.msra.mxu0 %v32_v29 }
 0x136   :  { %361 = vrot.lane.b32.xlu1 %v344_v42, %s1120_s9  ;;  %v350_v36 = vld [vmem:[#allocation2 + $0x13] ss:$2 sm:$0xff]  ;;  %v348_v38 = vld [vmem:[#allocation2 + $0x3] ss:$2 sm:$0xff]  ;;  %v401_v41 = vld [vmem:[#allocation2 + $0x2a] ss:$2 sm:$0xff] }
 0x137   :  { %v397_v39 = vld [vmem:[#allocation2 + $0x29] ss:$2 sm:$0xff]  ;;  %v395_v40 = vld [vmem:[#allocation2 + $0x19] ss:$2 sm:$0xff]  ;;  %v399_v44 = vld [vmem:[#allocation2 + $0x1a] ss:$2 sm:$0xff] }
 0x138   :  { %v405_v45 = vld [vmem:[#allocation2 + $0x2b] ss:$2 sm:$0xff]  ;;  %v403_v46 = vld [vmem:[#allocation2 + $0x1b] ss:$2 sm:$0xff]  ;;  %v338_v53 = vld [vmem:[#allocation2 + $0x10] ss:$2 sm:$0xff] }
 0x139   :  { %355 = vrot.lane.b32.xlu0 %v342_v9, %s1121_s10  ;;  %v393_v3 = vld [vmem:[#allocation2 + $0x28] ss:$2 sm:$0xff]  ;;  %v391_v4 = vld [vmem:[#allocation2 + $0x18] ss:$2 sm:$0xff] }
 0x13a   :  { %363 = vrot.lane.b32.xlu1 %v346_v5, %s1120_s9 }
 0x13d   :  { %372 = vrot.lane.b32.xlu0 %v344_v42, %s1121_s10 }
 0x13e   :  { %374 = vrot.lane.b32.xlu1 %v346_v5, %s1121_s10 }
 0x141   :  { %380 = vrot.lane.b32.xlu0 %v348_v38, %s1120_s9 }
 0x142   :  { %382 = vrot.lane.b32.xlu1 %v350_v36, %s1120_s9 }
 0x145   :  { %408 = vrot.lane.b32.xlu0 %v395_v40, %s1121_s10 }
 0x146   :  { %410 = vrot.lane.b32.xlu1 %v397_v39, %s1121_s10 }
 0x149   :  { %416 = vrot.lane.b32.xlu0 %v399_v44, %s1120_s9 }
 0x14a   :  { %418 = vrot.lane.b32.xlu1 %v401_v41, %s1120_s9 }
 0x14d   :  { %426 = vrot.lane.b32.xlu0 %v399_v44, %s1121_s10 }
 0x14e   :  { %428 = vrot.lane.b32.xlu1 %v401_v41, %s1121_s10 }
 0x151   :  { %434 = vrot.lane.b32.xlu0 %v403_v46, %s1120_s9 }
 0x152   :  { %436 = vrot.lane.b32.xlu1 %v405_v45, %s1120_s9 }
 0x1a7   :  { %v354_v48 = vpop.permute.xlu0 %353 }
 0x1a8   :  { %v362_v47 = vpop.permute.xlu1 %361  ;;  %v367_v50 = vsel %vm237_vm3, %v336_v49, %v354_v48 }
 0x1a9   :  { %v370_v51 = vsel %vm369_vm5, %v367_v50, %v362_v47 }
 0x1aa   :  { %1072 = vmatprep.mubr.msk.f32.mxu1 %vm448_vm6, %v370_v51 }
 0x1ab   :  { %v356_v54 = vpop.permute.xlu0 %355 }
 0x1ac   :  { %v364_v52 = vpop.permute.xlu1 %363  ;;  %v368_v55 = vsel %vm237_vm3, %v338_v53, %v356_v54 }
 0x1ad   :  { %v371_v56 = vsel %vm369_vm5, %v368_v55, %v364_v52 }
 0x1ae   :  { %1073 = vmatmul.mubr.msk.f32.vlgmr.msra.gmra.mxu1 %vm448_vm6, %v371_v56 }
 0x1af   :  { %v373_v58 = vpop.permute.xlu0 %372 }
 0x1b0   :  { %v375_v57 = vpop.permute.xlu1 %374  ;;  %v386_v60 = vsel %vm237_vm3, %v340_v43, %v373_v58 }
 0x1b1   :  { %v387_v59 = vsel %vm237_vm3, %v342_v9, %v375_v57 }
 0x1b3   :  { %v381_v62 = vpop.permute.xlu0 %380 }
 0x1b4   :  { %v383_v61 = vpop.permute.xlu1 %382  ;;  %v388_v0 = vsel %vm369_vm5, %v386_v60, %v381_v62 }
 0x1b5   :  { %v389_v63 = vsel %vm369_vm5, %v387_v59, %v383_v61  ;;  %1075 = vmatprep.mubr.msk.f32.mxu1 %vm448_vm6, %v388_v0 }
 0x1b6   :  { %1076 = vmatmul.mubr.msk.f32.gmra.mxu1 %vm448_vm6, %v389_v63 }
 0x1b7   :  { %v409_v2 = vpop.permute.xlu0 %408 }
 0x1b8   :  { %v411_v1 = vpop.permute.xlu1 %410  ;;  %v422_v7 = vsel %vm237_vm3, %v391_v4, %v409_v2 }
 0x1b9   :  { %v423_v6 = vsel %vm237_vm3, %v393_v3, %v411_v1 }
 0x1bb   :  { %v417_v11 = vpop.permute.xlu0 %416 }
 0x1bc   :  { %v419_v8 = vpop.permute.xlu1 %418  ;;  %v424_v13 = vsel %vm369_vm5, %v422_v7, %v417_v11 }
 0x1bd   :  { %v425_v12 = vsel %vm369_vm5, %v423_v6, %v419_v8  ;;  %1078 = vmatprep.mubr.msk.f32.mxu1 %vm448_vm6, %v424_v13 }
 0x1be   :  { %1079 = vmatmul.mubr.msk.f32.gmra.mxu1 %vm448_vm6, %v425_v12 }
 0x1bf   :  { %v427_v18 = vpop.permute.xlu0 %426 }
 0x1c0   :  { %v429_v17 = vpop.permute.xlu1 %428  ;;  %v440_v20 = vsel %vm237_vm3, %v395_v40, %v427_v18 }
 0x1c1   :  { %v441_v19 = vsel %vm237_vm3, %v397_v39, %v429_v17 }
 0x1c3   :  { %v435_v22 = vpop.permute.xlu0 %434 }
 0x1c4   :  { %v437_v21 = vpop.permute.xlu1 %436  ;;  %v442_v24 = vsel %vm369_vm5, %v440_v20, %v435_v22 }
 0x1c5   :  { %v443_v23 = vsel %vm369_vm5, %v441_v19, %v437_v21  ;;  %1081 = vmatprep.mubr.msk.f32.mxu1 %vm448_vm6, %v442_v24 }
 0x1c6   :  { %1082 = vmatmul.mubr.msk.f32.gmra.mxu1 %vm448_vm6, %v443_v23 }
 0x26e   :  { %v1074_v10 = vpop.f32.mrf.mxu1 }
 0x26f   :  { %v549_v42 = vadd.f32 %v1074_v10, %v447_v32 }
 0x270   :  { %v543_v31 = vpop.f32.mrf.mxu1 }
 0x271   :  { %v544_v34 = vadd.f32 %v543_v31, %v447_v32  ;;  %v583_v38 = vmax.f32 %v549_v42, 0.0 }
 0x273   :  { %v582_v5 = vmax.f32 %v544_v34, 0.0 }
 0x276   :  { %v1077_v33 = vpop.f32.mrf.mxu1 }
 0x277   :  { %v559_v35 = vadd.f32 %v1077_v33, %v447_v32 }
 0x278   :  { %v553_v37 = vpop.f32.mrf.mxu1 }
 0x279   :  { %v554_v43 = vadd.f32 %v553_v37, %v447_v32  ;;  %v585_v9 = vmax.f32 %v559_v35, 0.0 }
 0x27b   :  { %v584_v36 = vmax.f32 %v554_v43, 0.0  ;;  %v1339_v40 = vmax.f32 %v583_v38, %v585_v9 }
 0x27d   :  { %v1337_v39 = vmax.f32 %v582_v5, %v584_v36  ;;  %v597_v45 = vsel %vm596_vm9, %v1339_v40, 0.0 }
 0x27e   :  { %v1080_v41 = vpop.f32.mrf.mxu1 }
 0x27f   :  { %v595_v44 = vsel %vm594_vm8, %v1337_v39, 0.0  ;;  %v569_v48 = vadd.f32 %v1080_v41, %v447_v32 }
 0x280   :  { %v598_v46 = vadd.f32 %v597_v45, %v595_v44  ;;  %v563_v47 = vpop.f32.mrf.mxu1 }
 0x281   :  { %v564_v50 = vadd.f32 %v563_v47, %v447_v32  ;;  %v587_v54 = vmax.f32 %v569_v48, 0.0  ;;  %v657_v48 = vsub.s32 4, %v1195_v14 }
 0x282   :  { %v599_v52 = vrot.slane %v598_v46, 4 }
 0x283   :  { %v586_v57 = vmax.f32 %v564_v50, 0.0 }
 0x284   :  { %v600_v60 = vadd.f32 %v599_v52, %v598_v46 }
 0x286   :  { %v1083_v49 = vpop.f32.mrf.mxu1  ;;  %v601_v0 = vrot.slane %v600_v60, 2 }
 0x287   :  { %v579_v51 = vadd.f32 %v1083_v49, %v447_v32 }
 0x288   :  { %v573_v53 = vpop.f32.mrf.mxu1  ;;  %v602_v3 = vadd.f32 %v601_v0, %v600_v60 }
 0x289   :  { %v589_v55 = vmax.f32 %v579_v51, 0.0  ;;  %v574_v56 = vadd.f32 %v573_v53, %v447_v32  ;;  %v661_v53 = vsub.s32 5, %v1195_v14 }
 0x28a   :  { %v603_v7 = vrot.slane %v602_v3, 1 }
 0x28b   :  { %v1345_v58 = vmax.f32 %v587_v54, %v589_v55  ;;  %v588_v59 = vmax.f32 %v574_v56, 0.0  ;;  %v31_v56 = vld [vmem:[%s1414_s1 + $0x78] sm:$0xff] }
 0x28c   :  { %v604_v12 = vadd.f32 %v603_v7, %v602_v3  ;;  %1094 = vmatprep.subr.mxu0 %v31_v56 }
 0x28d   :  { %v592_v61 = vmax.f32 %v586_v57, %v588_v59  ;;  %v607_v62 = vsel %vm596_vm9, %v1345_v58, 0.0  ;;  %v30_v57 = vld [vmem:[%s1414_s1 + $0x70] sm:$0xff]  ;;  %1095 = vmatpush3.msra.mxu0 %v31_v56 }
 0x28e   :  { %1096 = vmatprep.subr.mxu0 %v30_v57 }
 0x28f   :  { %v606_v63 = vsel %vm594_vm8, %v592_v61, 0.0  ;;  %1097 = vmatpush3.msra.mxu0 %v30_v57 }
 0x290   :  { %v608_v1 = vadd.f32 %v607_v62, %v606_v63 }
 0x292   :  { %v609_v2 = vrot.slane %v608_v1, 4 }
 0x294   :  { %v610_v4 = vadd.f32 %v609_v2, %v608_v1 }
 0x296   :  { %v611_v6 = vrot.slane %v610_v4, 2 }
 0x298   :  { %v612_v8 = vadd.f32 %v611_v6, %v610_v4 }
 0x29a   :  { %v613_v11 = vrot.slane %v612_v8, 1 }
 0x29c   :  { %v614_v13 = vadd.f32 %v613_v11, %v612_v8 }
 0x29e   :  { %v615_v17 = vadd.f32 %v614_v13, %v604_v12 }
 0x2a0   :  { %v617_v18 = vmul.f32 0.05, %v615_v17 }
 0x2a2   :  { %v618_v19 = vsub.f32 %v1337_v39, %v617_v18  ;;  %v619_v20 = vsub.f32 %v1339_v40, %v617_v18  ;;  %v632_v21 = vsub.f32 %v592_v61, %v617_v18  ;;  %v633_v22 = vsub.f32 %v1345_v58, %v617_v18 }
 0x2a4   :  { %v620_v23 = vmul.f32 %v618_v19, %v618_v19  ;;  %v621_v24 = vmul.f32 %v619_v20, %v619_v20  ;;  %v634_v25 = vmul.f32 %v632_v21, %v632_v21  ;;  %v635_v26 = vmul.f32 %v633_v22, %v633_v22 }
 0x2a6   :  { %v622_v27 = vsel %vm594_vm8, %v620_v23, 0.0  ;;  %v623_v28 = vsel %vm596_vm9, %v621_v24, 0.0  ;;  %v636_v29 = vsel %vm594_vm8, %v634_v25, 0.0  ;;  %v637_v10 = vsel %vm596_vm9, %v635_v26, 0.0 }
 0x2a7   :  { %v624_v30 = vadd.f32 %v623_v28, %v622_v27  ;;  %v638_v31 = vadd.f32 %v637_v10, %v636_v29 }
 0x2a9   :  { %v625_v32 = vrot.slane %v624_v30, 4  ;;  %v639_v33 = vrot.slane %v638_v31, 4 }
 0x2ab   :  { %v626_v34 = vadd.f32 %v625_v32, %v624_v30  ;;  %v640_v35 = vadd.f32 %v639_v33, %v638_v31  ;;  %v731_v30 = vsub.s32 6, %v1195_v14 }
 0x2ad   :  { %v627_v37 = vrot.slane %v626_v34, 2  ;;  %v641_v42 = vrot.slane %v640_v35, 2  ;;  %v732_v31 = vrot.slane %v1201_v16, %v731_v30 }
 0x2af   :  { %v628_v43 = vadd.f32 %v627_v37, %v626_v34  ;;  %v642_v5 = vadd.f32 %v641_v42, %v640_v35 }
 0x2b1   :  { %v629_v9 = vrot.slane %v628_v43, 1  ;;  %v643_v36 = vrot.slane %v642_v5, 1 }
 0x2b3   :  { %v630_v38 = vadd.f32 %v629_v9, %v628_v43  ;;  %v644_v41 = vadd.f32 %v643_v36, %v642_v5 }
 0x2b5   :  { %v645_v44 = vadd.f32 %v644_v41, %v630_v38 }
 0x2b7   :  { %v646_v45 = vmul.f32 0.05, %v645_v44 }
 0x2b9   :  { %v647_v46 = vadd.f32 1e-05, %v646_v45 }
 0x2bb   :  { %1112 = vrsqrt.f32 %v647_v46 }
 0x2c8   :  { %v1113_v47 = vpop.eup %1112 }
 0x2c9   :  { %v649_v49 = vmul.f32 %v1113_v47, %v1201_v16 }
 0x2cb   :  { %v650_v50 = vmul.f32 %v649_v49, %v617_v18  ;;  %v658_v51 = vrot.slane %v649_v49, %v657_v48 }
 0x2cd   :  { %v652_v52 = vrot.slane %v650_v50, 7  ;;  %v663_v55 = vmul.f32 %v658_v51, %v1337_v39  ;;  %v664_v60 = vmul.f32 %v658_v51, %v1339_v40  ;;  %v669_v62 = vmul.f32 %v658_v51, %v592_v61  ;;  %v29_v40 = vld [vmem:[%s1414_s1 + $0x68] sm:$0xff] }
 0x2ce   :  { %v670_v63 = vmul.f32 %v658_v51, %v1345_v58  ;;  %1098 = vmatprep.subr.mxu0 %v29_v40 }
 0x2cf   :  { %v654_v54 = vsub.f32 %v1201_v16, %v652_v52  ;;  %1099 = vmatpush3.msra.mxu0 %v29_v40 }
 0x2d1   :  { %v662_v59 = vrot.slane %v654_v54, %v661_v53 }
 0x2d3   :  { %v665_v0 = vadd.f32 %v663_v55, %v662_v59  ;;  %v666_v39 = vadd.f32 %v664_v60, %v662_v59  ;;  %v671_v1 = vadd.f32 %v669_v62, %v662_v59  ;;  %v672_v2 = vadd.f32 %v670_v63, %v662_v59 }
 0x2d5   :  { %667 = vst.msk [vmem:[#allocation3] sm:$0xff] %vm594_vm8, %v665_v0  ;;  %673 = vst.msk [vmem:[#allocation3 + $0x10] sm:$0xff] %vm594_vm8, %v671_v1 }
 0x2d6   :  { %668 = vst.msk [vmem:[#allocation3 + $0x8] sm:$0x3] %vm596_vm9, %v666_v39  ;;  %674 = vst.msk [vmem:[#allocation3 + $0x18] sm:$0x3] %vm596_vm9, %v672_v2 }
 0x2dd   :  { %v679_v58 = vld [vmem:[#allocation3 + $0x2] ss:$2 sm:$0xff]  ;;  %v677_v61 = vld [vmem:[#allocation3 + $0x1] ss:$2 sm:$0xff]  ;;  %v707_v4 = vld [vmem:[#allocation3 + $0x12] ss:$2 sm:$0xff] }
 0x2de   :  { %687 = vrot.lane.b32.xlu1 %v679_v58, %s1122_s26  ;;  %683 = vrot.lane.b32.xlu0 %v677_v61, %s1123_s27  ;;  %v681_v3 = vld [vmem:[#allocation3 + $0x3] ss:$2 sm:$0xff]  ;;  %v709_v7 = vld [vmem:[#allocation3 + $0x13] ss:$2 sm:$0xff]  ;;  %v675_v12 = vld [vmem:[#allocation3] ss:$2 sm:$0xff] }
 0x2df   :  { %v705_v6 = vld [vmem:[#allocation3 + $0x11] ss:$2 sm:$0xff]  ;;  %v703_v23 = vld [vmem:[#allocation3 + $0x10] ss:$2 sm:$0xff] }
 0x2e2   :  { %697 = vrot.lane.b32.xlu1 %v681_v3, %s1122_s26  ;;  %693 = vrot.lane.b32.xlu0 %v679_v58, %s1123_s27 }
 0x2e6   :  { %715 = vrot.lane.b32.xlu1 %v707_v4, %s1122_s26  ;;  %711 = vrot.lane.b32.xlu0 %v705_v6, %s1123_s27 }
 0x2ea   :  { %724 = vrot.lane.b32.xlu1 %v709_v7, %s1122_s26  ;;  %720 = vrot.lane.b32.xlu0 %v707_v4, %s1123_s27 }
 0x350   :  { %v688_v8 = vpop.permute.xlu1 %687  ;;  %v684_v11 = vpop.permute.xlu0 %683 }
 0x351   :  { %v690_v13 = vsel %vm594_vm8, %v675_v12, %v684_v11 }
 0x352   :  { %v692_v17 = vsel %vm691_vm10, %v690_v13, %v688_v8 }
 0x353   :  { %1100 = vmatprep.mubr.msk.f32.mxu0 %vm369_vm5, %v692_v17 }
 0x354   :  { %v698_v18 = vpop.permute.xlu1 %697  ;;  %v694_v19 = vpop.permute.xlu0 %693 }
 0x355   :  { %v700_v20 = vsel %vm594_vm8, %v677_v61, %v694_v19 }
 0x356   :  { %v701_v21 = vsel %vm691_vm10, %v700_v20, %v698_v18 }
 0x357   :  { %1101 = vmatmul.mubr.msk.f32.vlgmr.msra.gmra.mxu0 %vm369_vm5, %v701_v21 }
 0x358   :  { %v716_v22 = vpop.permute.xlu1 %715  ;;  %v712_v24 = vpop.permute.xlu0 %711 }
 0x359   :  { %v718_v25 = vsel %vm594_vm8, %v703_v23, %v712_v24  ;;  %v890_v24 = vsub.s32 7, %v1195_v14 }
 0x35a   :  { %v719_v26 = vsel %vm691_vm10, %v718_v25, %v716_v22 }
 0x35b   :  { %1103 = vmatprep.mubr.msk.f32.mxu0 %vm369_vm5, %v719_v26 }
 0x35c   :  { %v725_v27 = vpop.permute.xlu1 %724  ;;  %v721_v28 = vpop.permute.xlu0 %720 }
 0x35d   :  { %v727_v29 = vsel %vm594_vm8, %v705_v6, %v721_v28 }
 0x35e   :  { %v728_v10 = vsel %vm691_vm10, %v727_v29, %v725_v27  ;;  %v15_v27 = vld [vmem:[%s1416_s2 + $0x8] sm:$0xff] }
 0x35f   :  { %1104 = vmatmul.mubr.msk.f32.gmra.mxu0 %vm369_vm5, %v728_v10 }
 0x417   :  { %v1102_v32 = vpop.f32.mrf.mxu0 }
 0x418   :  { %v821_v33 = vadd.f32 %v1102_v32, %v732_v31 }
 0x419   :  { %v815_v34 = vpop.f32.mrf.mxu0 }
 0x41a   :  { %v816_v35 = vadd.f32 %v815_v34, %v732_v31  ;;  %v835_v37 = vmax.f32 %v821_v33, 0.0 }
 0x41c   :  { %v834_v42 = vmax.f32 %v816_v35, 0.0 }
 0x41e   :  { %v838_v43 = vmax.f32 %v834_v42, %v835_v37 }
 0x41f   :  { %v1105_v5 = vpop.f32.mrf.mxu0 }
 0x420   :  { %v841_v9 = vsel %vm840_vm11, %v838_v43, 0.0  ;;  %v831_v36 = vadd.f32 %v1105_v5, %v732_v31 }
 0x421   :  { %v842_v38 = vrot.slane %v841_v9, 4  ;;  %v825_v41 = vpop.f32.mrf.mxu0 }
 0x422   :  { %v826_v44 = vadd.f32 %v825_v41, %v732_v31  ;;  %v837_v46 = vmax.f32 %v831_v36, 0.0 }
 0x423   :  { %v843_v45 = vadd.f32 %v842_v38, %v841_v9 }
 0x424   :  { %v836_v47 = vmax.f32 %v826_v44, 0.0 }
 0x425   :  { %v844_v49 = vrot.slane %v843_v45, 2 }
 0x426   :  { %v839_v48 = vmax.f32 %v836_v47, %v837_v46 }
 0x427   :  { %v845_v52 = vadd.f32 %v844_v49, %v843_v45 }
 0x428   :  { %v849_v50 = vsel %vm840_vm11, %v839_v48, 0.0 }
 0x429   :  { %v850_v51 = vrot.slane %v849_v50, 4  ;;  %v846_v56 = vrot.slane %v845_v52, 1 }
 0x42b   :  { %v851_v54 = vadd.f32 %v850_v51, %v849_v50  ;;  %v847_v60 = vadd.f32 %v846_v56, %v845_v52 }
 0x42d   :  { %v852_v55 = vrot.slane %v851_v54, 2 }
 0x42f   :  { %v853_v57 = vadd.f32 %v852_v55, %v851_v54 }
 0x431   :  { %v854_v59 = vrot.slane %v853_v57, 1 }
 0x433   :  { %v855_v62 = vadd.f32 %v854_v59, %v853_v57 }
 0x435   :  { %v856_v63 = vadd.f32 %v855_v62, %v847_v60 }
 0x437   :  { %v858_v0 = vmul.f32 0.125, %v856_v63 }
 0x439   :  { %v859_v39 = vsub.f32 %v838_v43, %v858_v0  ;;  %v869_v1 = vsub.f32 %v839_v48, %v858_v0 }
 0x43b   :  { %v860_v2 = vmul.f32 %v859_v39, %v859_v39  ;;  %v870_v40 = vmul.f32 %v869_v1, %v869_v1 }
 0x43d   :  { %v861_v58 = vsel %vm840_vm11, %v860_v2, 0.0  ;;  %v871_v61 = vsel %vm840_vm11, %v870_v40, 0.0 }
 0x43e   :  { %v862_v3 = vrot.slane %v861_v58, 4  ;;  %v872_v4 = vrot.slane %v871_v61, 4 }
 0x440   :  { %v863_v6 = vadd.f32 %v862_v3, %v861_v58  ;;  %v873_v7 = vadd.f32 %v872_v4, %v871_v61 }
 0x442   :  { %v864_v8 = vrot.slane %v863_v6, 2  ;;  %v874_v11 = vrot.slane %v873_v7, 2 }
 0x444   :  { %v865_v12 = vadd.f32 %v864_v8, %v863_v6  ;;  %v875_v13 = vadd.f32 %v874_v11, %v873_v7 }
 0x446   :  { %v866_v17 = vrot.slane %v865_v12, 1  ;;  %v876_v18 = vrot.slane %v875_v13, 1 }
 0x448   :  { %v867_v19 = vadd.f32 %v866_v17, %v865_v12  ;;  %v877_v20 = vadd.f32 %v876_v18, %v875_v13 }
 0x44a   :  { %v878_v21 = vadd.f32 %v877_v20, %v867_v19 }
 0x44c   :  { %v879_v22 = vmul.f32 0.125, %v878_v21 }
 0x44e   :  { %v880_v23 = vadd.f32 1e-05, %v879_v22 }
 0x450   :  { %1114 = vrsqrt.f32 %v880_v23 }
 0x45d   :  { %v1115_v25 = vpop.eup %1114 }
 0x45e   :  { %v882_v26 = vmul.f32 %v1115_v25, %v1201_v16 }
 0x460   :  { %v891_v28 = vrot.slane %v882_v26, %v890_v24  ;;  %v883_v29 = vmul.f32 %v882_v26, %v858_v0 }
 0x462   :  { %v892_v10 = vmul.f32 %v891_v28, %v15_v27  ;;  %v885_v30 = vrot.slane %v883_v29, 7 }
 0x464   :  { %v914_v31 = vrot.slane %v892_v10, 1  ;;  %v887_v32 = vsub.f32 %v15_v27, %v885_v30 }
 0x466   :  { %v916_v33 = vmul.f32 %v914_v31, %v838_v43  ;;  %v896_v34 = vrot.slane %v887_v32, %v51_v15  ;;  %v927_v42 = vmul.f32 %v914_v31, %v839_v48 }
 0x468   :  { %v917_v35 = vsel %vm840_vm11, %v916_v33, 0.0  ;;  %v897_v37 = vmul.f32 %v896_v34, %v15_v27  ;;  %v928_v5 = vsel %vm840_vm11, %v927_v42, 0.0 }
 0x469   :  { %918 = vadd.xlane.f32.xlu1 %v917_v35 }
 0x46a   :  { %v899_v16 = vsel %vm898_vm12, %v897_v37, 0.0 }
 0x46b   :  { %900 = vadd.xlane.f32.xlu0 %v899_v16 }
 0x46f   :  { %929 = vadd.xlane.f32.xlu0 %v928_v5 }
 0x4f2   :  { %v919_v9 = vpop.xlane.xlu1 %918 }
 0x4f3   :  { %v920_v36 = vsel %vm745_vm7, %v919_v9, 0.0 }
 0x4f4   :  { %v921_v38 = vrot.slane %v920_v36, 4  ;;  %v901_v41 = vpop.xlane.xlu0 %900 }
 0x4f5   :  { %v903_v43 = vrot.slane %v901_v41, 1 }
 0x4f6   :  { %v922_v44 = vadd.f32 %v921_v38, %v920_v36 }
 0x4f7   :  { %v905_v15 = vsel %vm745_vm7, %v903_v43, 0.0 }
 0x4f8   :  { %v923_v45 = vrot.slane %v922_v44, 2  ;;  %v906_v46 = vrot.slane %v905_v15, 4  ;;  %v930_v47 = vpop.xlane.xlu0 %929 }
 0x4f9   :  { %v931_v49 = vsel %vm745_vm7, %v930_v47, 0.0 }
 0x4fa   :  { %v907_v50 = vadd.f32 %v906_v46, %v905_v15  ;;  %v932_v48 = vrot.slane %v931_v49, 4  ;;  %v924_v51 = vadd.f32 %v923_v45, %v922_v44 }
 0x4fc   :  { %v908_v52 = vrot.slane %v907_v50, 2  ;;  %v933_v54 = vadd.f32 %v932_v48, %v931_v49  ;;  %v925_v57 = vrot.slane %v924_v51, 1 }
 0x4fe   :  { %v909_v55 = vadd.f32 %v908_v52, %v907_v50  ;;  %v934_v56 = vrot.slane %v933_v54, 2  ;;  %v926_v0 = vadd.f32 %v925_v57, %v924_v51 }
 0x500   :  { %v910_v59 = vrot.slane %v909_v55, 1  ;;  %v935_v60 = vadd.f32 %v934_v56, %v933_v54 }
 0x502   :  { %v911_v62 = vadd.f32 %v910_v59, %v909_v55  ;;  %v936_v63 = vrot.slane %v935_v60, 1 }
 0x504   :  { %v912_v39 = vadd.f32 %v911_v62, %v15_v27  ;;  %v937_v1 = vadd.f32 %v936_v63, %v935_v60 }
 0x506   :  { %v943_v2 = vrot.slane %v912_v39, %v661_v53  ;;  %v939_v40 = vsel %vm938_vm13, %v926_v0, %v937_v1 }
 0x508   :  { %v944_v58 = vadd.f32 %v943_v2, %v939_v40 }
 0x50a   :  { %v945_v61 = vsub.f32 0.0, %v944_v58 }
 0x50c   :  { %v946_v3 = vmul.f32 1.442695, %v945_v61 }
 0x50e   :  { %1116 = vpow2.f32 %v946_v3 }
 0x51b   :  { %v1117_v4 = vpop.eup %1116 }
 0x51c   :  { %v948_v6 = vadd.f32 1.0, %v1117_v4 }
 0x51e   :  { %1118 = vrcp.f32 %v948_v6 }
 0x52b   :  { %v1119_v7 = vpop.eup %1118 }
 0x52c   :  { %951 = vst.msk [vmem:[%s1417_s3] sm:$0x3] %vm950_vm14, %v1119_v7 }

</bundles_post_ra>
